<compile_context>
chip_gen: v5e
topology: v5e:2x2
jax: 0.10.0
libtpu: 0.0.40
codegen_flags: <defaults>
</compile_context>

<pallas_src>
import functools

import numpy as np

import jax
import jax.numpy as jnp
from jax.experimental import pallas as pl
from jax.experimental.pallas import tpu as pltpu


def _round_up(x, m):
    return (x + m - 1) // m * m


# ---------------------------------------------------------------------------
# Fused kernel.  Per (batch b, frame-tile ft):
#   reim  = [xf ; yf] @ [Bc | Bs]                   (single MXU matmul, bf16 -> f32)
#   p     = max(re^2 + im^2, 1e-7)                  (clamp from the PyTorch spec)
#   acc[0] += sum_rows (sqrt(py) - sqrt(px))^2      (spectral-convergence numerator)
#   acc[1] += sum_rows  py                          (spectral-convergence denominator)
#   acc[2] += sum_rows  0.5*|log(px/py)|            (log-magnitude L1 numerator)
# ---------------------------------------------------------------------------
def _stft_loss_kernel(xf_ref, yf_ref, rhs_ref, acc_ref):
    ft = pl.program_id(1)

    @pl.when(ft == 0)
    def _init():
        acc_ref[...] = jnp.zeros_like(acc_ref)

    tf = xf_ref.shape[1]
    kp = rhs_ref.shape[1] // 2

    # Stack x- and y-frames so the 256-wide MXU (v6e/v7x) sees a full LHS and the
    # basis RHS is pushed once per step.
    lhs = jnp.concatenate([xf_ref[0], yf_ref[0]], axis=0)              # (2*tf, n_fft) bf16
    reim = jnp.dot(lhs, rhs_ref[...],
                   preferred_element_type=jnp.float32)                  # (2*tf, 2*kp) f32

    re = reim[:, :kp]
    im = reim[:, kp:]
    power = jnp.maximum(re * re + im * im, 1e-7)
    px = power[:tf]                      # |STFT(x)|^2
    py = power[tf:]                      # |STFT(y)|^2

    diff = jnp.sqrt(py) - jnp.sqrt(px)
    acc_ref[0, 0:1] += jnp.sum(diff * diff, axis=0, keepdims=True)
    acc_ref[0, 1:2] += jnp.sum(py, axis=0, keepdims=True)               # |Y|^2 == py exactly
    # |log|X| - log|Y|| = 0.5*|log(px/py)|  -> one EUP log instead of two.
    acc_ref[0, 2:3] += 0.5 * jnp.sum(jnp.abs(jnp.log(px / py)),
                                     axis=0, keepdims=True)


# ---------------------------------------------------------------------------
# Host-precomputed windowed-DFT bases (hann window, periodic, centered & zero-padded
# to n_fft, exactly matching torch.stft defaults).  Cached per static config.
# ---------------------------------------------------------------------------
@functools.lru_cache(maxsize=None)
def _stft_constants(fft_size, win_length, kp):
    n = np.arange(win_length, dtype=np.float64)
    win = 0.5 - 0.5 * np.cos(2.0 * np.pi * n / win_length)   # torch.hann_window (periodic)
    left = (fft_size - win_length) // 2                       # torch.stft window centering
    w_full = np.zeros((fft_size,), np.float64)
    w_full[left:left + win_length] = win

    k = np.arange(kp)
    nk = (np.arange(fft_size)[:, None] * k[None, :]) % fft_size   # exact integer angles
    ang = 2.0 * np.pi * nk.astype(np.float64) / fft_size
    kvalid = (k < fft_size // 2)[None, :]
    bc = np.where(kvalid, np.cos(ang), 0.0) * w_full[:, None]
    bs = np.where(kvalid, np.sin(ang), 0.0) * w_full[:, None]
    rhs = np.concatenate([bc, bs], axis=1).astype(np.float32)     # (n_fft, 2*kp)

    # Nyquist bin basis (k = fft_size/2): cos(pi*n) = (-1)^n, sin(pi*n) = 0.
    w_nyq = (w_full * np.where(np.arange(fft_size) % 2 == 0, 1.0, -1.0)).astype(np.float32)
    return rhs, w_nyq


# ---------------------------------------------------------------------------
# Tile planning: biggest tile_f that fits a VMEM budget safe on v5e/v6e/v7x, plus an
# explicit scoped-VMEM limit derived from the real per-step block footprint.
# ---------------------------------------------------------------------------
def _plan_tiles(n_frames, fft_size, kp):
    rhs_bytes = fft_size * (2 * kp) * 2                  # bf16 bases, single-buffered

    def footprint(tf):
        frame_bytes = 2 * 2 * tf * fft_size * 2          # x & y blocks, double-buffered, bf16
        mxu_out = 2 * tf * (2 * kp) * 4                  # (2*tf, 2*kp) f32 matmul result
        epilogue = 4 * 2 * tf * kp * 4                   # power / sqrt / log temporaries
        out_bytes = 2 * 3 * kp * 4
        return rhs_bytes + frame_bytes + mxu_out + epilogue + out_bytes + (1 << 20)

    tile_f = min(256, max(16, _round_up(n_frames, 16)))  # 16-row granularity (bf16 packing)
    budget = 44 * 1024 * 1024                            # headroom under v7x's 64 MiB VMEM
    while tile_f > 16 and footprint(tile_f) > budget:
        tile_f = max(16, _round_up(tile_f // 2, 16))
    vmem_limit = int(min(max(1.5 * footprint(tile_f) + (8 << 20), 32 << 20), 60 << 20))
    return tile_f, vmem_limit


# ---------------------------------------------------------------------------
# STFTLoss forward: returns (spectral_convergence_loss, log_magnitude_loss).
# ---------------------------------------------------------------------------
@functools.partial(jax.jit, static_argnames=("fft_size", "shift_length", "win_length"))
def stft_loss(x, y, *, fft_size, shift_length, win_length):
    assert win_length <= fft_size and fft_size % 2 == 0
    B, T = x.shape
    pad = fft_size // 2
    n_half = fft_size // 2                  # bins 0 .. n_half-1 go through the MXU
    n_freq = n_half + 1                     # + the Nyquist bin, handled in the wrapper
    kp = max(128, _round_up(n_half, 128))   # lane-dense; == n_half for fft_size >= 256

    def frame(sig):
        sp = jnp.pad(sig, ((0, 0), (pad, pad)), mode="reflect")   # torch.stft center=True
        n_frames = 1 + (sp.shape[-1] - fft_size) // shift_length
        idx = (jnp.arange(n_frames)[:, None] * shift_length
               + jnp.arange(fft_size)[None, :])
        return sp[:, idx], n_frames                                 # (B, n_frames, n_fft) f32

    xf, n_frames = frame(x)
    yf, _ = frame(y)

    tile_f, vmem_limit = _plan_tiles(n_frames, fft_size, kp)
    n_ft = -(-n_frames // tile_f)
    f_pad = n_ft * tile_f

    rhs_np, w_nyq_np = _stft_constants(fft_size, win_length, kp)
    rhs = jnp.asarray(rhs_np, dtype=jnp.bfloat16)
    w_nyq = jnp.asarray(w_nyq_np)

    # Nyquist bin (imaginary part is exactly 0): tiny f32 matvec kept out of the kernel.
    rex = jnp.einsum("bfn,n->bf", xf, w_nyq)
    rey = jnp.einsum("bfn,n->bf", yf, w_nyq)
    mxn = jnp.sqrt(jnp.maximum(rex * rex, 1e-7))
    myn = jnp.sqrt(jnp.maximum(rey * rey, 1e-7))
    nyq_diff2 = jnp.sum((myn - mxn) ** 2)
    nyq_y2 = jnp.sum(myn * myn)
    nyq_log = jnp.sum(jnp.abs(jnp.log(mxn) - jnp.log(myn)))

    # bf16 frames for the MXU (f32 accumulation inside); pad frame axis to tile multiple.
    xfb = xf.astype(jnp.bfloat16)
    yfb = yf.astype(jnp.bfloat16)
    if f_pad != n_frames:
        xfb = jnp.pad(xfb, ((0, 0), (0, f_pad - n_frames), (0, 0)))
        yfb = jnp.pad(yfb, ((0, 0), (0, f_pad - n_frames), (0, 0)))

    # NOTE: for B == 1 on v7x, a second "parallel" grid axis splitting the frame tiles
    # would keep both TensorCores busy; omitted here for simplicity.
    acc = pl.pallas_call(
        _stft_loss_kernel,
        out_shape=jax.ShapeDtypeStruct((B, 3, kp), jnp.float32),
        grid=(B, n_ft),
        in_specs=[
            pl.BlockSpec((1, tile_f, fft_size), lambda b, f: (b, f, 0)),
            pl.BlockSpec((1, tile_f, fft_size), lambda b, f: (b, f, 0)),
            pl.BlockSpec((fft_size, 2 * kp), lambda b, f: (0, 0),
                         pipeline_mode=pl.Buffered(1)),   # constant bases: single buffer
        ],
        out_specs=pl.BlockSpec((1, 3, kp), lambda b, f: (b, 0, 0)),
        compiler_params=pltpu.CompilerParams(
            dimension_semantics=("parallel", "arbitrary"),
            vmem_limit_bytes=vmem_limit),
    )(xfb, yfb, rhs)

    sums = jnp.sum(acc, axis=(0, 2))        # [sum diff^2, sum |Y|^2, sum |log ratio|]
    # Zero-padded frame rows / basis lanes clamp both powers to exactly 1e-7: they add 0
    # to the diff^2 and log sums, and a known constant to sum |Y|^2 — subtract it here.
    pad_cells = B * (f_pad * kp - n_frames * n_half)
    sum_d2 = sums[0] + nyq_diff2
    sum_y2 = sums[1] - pad_cells * 1e-7 + nyq_y2
    sum_lg = sums[2] + nyq_log

    sc_loss = jnp.sqrt(sum_d2) / jnp.sqrt(sum_y2)
    mag_loss = sum_lg / (B * n_frames * n_freq)
    return sc_loss, mag_loss


# ---------------------------------------------------------------------------
# Pure-JAX reference mirroring the PyTorch module (via rfft, f32).
# ---------------------------------------------------------------------------
def _reference_stft_loss(x, y, fft_size, shift_length, win_length):
    def magnitude(sig):
        pad = fft_size // 2
        sp = jnp.pad(sig, ((0, 0), (pad, pad)), mode="reflect")
        n_frames = 1 + (sp.shape[-1] - fft_size) // shift_length
        idx = (jnp.arange(n_frames)[:, None] * shift_length
               + jnp.arange(fft_size)[None, :])
        frames = sp[:, idx]
        n = jnp.arange(win_length, dtype=jnp.float32)
        win = 0.5 - 0.5 * jnp.cos(2.0 * jnp.pi * n / win_length)
        left = (fft_size - win_length) // 2
        w_full = jnp.zeros((fft_size,), jnp.float32).at[left:left + win_length].set(win)
        spec = jnp.fft.rfft(frames * w_full, axis=-1)
        power = spec.real ** 2 + spec.imag ** 2
        return jnp.sqrt(jnp.maximum(power, 1e-7))              # (B, F, n_freq)

    xm = magnitude(x)
    ym = magnitude(y)
    sc = jnp.linalg.norm((ym - xm).reshape(-1)) / jnp.linalg.norm(ym.reshape(-1))
    mag = jnp.mean(jnp.abs(jnp.log(xm) - jnp.log(ym)))
    return sc, mag


if __name__ == "__main__":
    # small deterministic config (win_length < fft_size exercises window centering;
    # fft_size=256 gives a lane-exact KP=128 with the Nyquist bin split out)
    fft_size, shift_length, win_length = 256, 64, 128
    B, T = 2, 512

    key = jax.random.PRNGKey(0)
    kx, ky = jax.random.split(key)
    x = jax.random.normal(kx, (B, T), dtype=jnp.float32)
    y = 0.7 * x + 0.3 * jax.random.normal(ky, (B, T), dtype=jnp.float32)

    sc, mag = stft_loss(x, y, fft_size=fft_size,
                        shift_length=shift_length, win_length=win_length)
    sc, mag = jax.block_until_ready((sc, mag))

    sc_ref, mag_ref = _reference_stft_loss(x, y, fft_size, shift_length, win_length)

    assert jnp.isfinite(sc) and jnp.isfinite(mag), (sc, mag)
    # bf16 MXU inputs give ~0.1-0.3% spectral error vs the f32 rfft reference.
    assert jnp.allclose(sc, sc_ref, rtol=1e-2, atol=1e-4), (float(sc), float(sc_ref))
    assert jnp.allclose(mag, mag_ref, rtol=1e-2, atol=1e-4), (float(mag), float(mag_ref))

    print("KERNEL_OK")
</pallas_src>

<mosaic_0001>
module attributes {stable_mosaic.version = 11 : i64} {
  func.func @_stft_loss_kernel(%arg0: i32, %arg1: i32, %arg2: memref<1x16x256xbf16, #tpu.memory_space<vmem>>, %arg3: memref<1x16x256xbf16, #tpu.memory_space<vmem>>, %arg4: memref<256x256xbf16, #tpu.memory_space<vmem>>, %arg5: memref<1x3x128xf32, #tpu.memory_space<vmem>>) attributes {dimension_semantics = [#tpu.dimension_semantics<parallel>, #tpu.dimension_semantics<arbitrary>], iteration_bounds = array<i64: 2, 1>, scalar_prefetch = 0 : i64, scratch_operands = 0 : i64, tpu.core_type = #tpu.core_type<tc>, window_params = [{transform_indices = @transform_0, window_bounds = array<i64: 1, 16, 256>}, {transform_indices = @transform_1, window_bounds = array<i64: 1, 16, 256>}, {pipeline_mode = #tpu.pipeline_mode<synchronous>, transform_indices = @transform_2, window_bounds = array<i64: 256, 256>}, {transform_indices = @transform_3, window_bounds = array<i64: 1, 3, 128>}]} {
    %c0_i32 = arith.constant 0 : i32
    %0 = arith.cmpi eq, %arg1, %c0_i32 : i32
    %1 = arith.extui %0 : i1 to i32
    %c0_i32_0 = arith.constant 0 : i32
    %2 = arith.cmpi ne, %1, %c0_i32_0 : i32
    scf.if %2 {
      %cst_29 = arith.constant 0.000000e+00 : f32
      %52 = vector.broadcast %cst_29 : f32 to vector<1x3x128xf32>
      %c0_30 = arith.constant 0 : index
      %c0_31 = arith.constant 0 : index
      %c0_32 = arith.constant 0 : index
      %53 = vector.load %arg5[%c0_30, %c0_31, %c0_32] : memref<1x3x128xf32, #tpu.memory_space<vmem>>, vector<1x3x128xf32>
      tpu.vector_store %arg5[%c0_30, %c0_31, %c0_32], %52 {strides = array<i32>} : memref<1x3x128xf32, #tpu.memory_space<vmem>>, vector<1x3x128xf32>,
    } else {
    }
    %c0 = arith.constant 0 : index
    %c0_1 = arith.constant 0 : index
    %c0_2 = arith.constant 0 : index
    %3 = vector.load %arg2[%c0, %c0_1, %c0_2] : memref<1x16x256xbf16, #tpu.memory_space<vmem>>, vector<1x16x256xbf16>
    %4 = vector.shape_cast %3 : vector<1x16x256xbf16> to vector<16x256xbf16>
    %c0_3 = arith.constant 0 : index
    %c0_4 = arith.constant 0 : index
    %c0_5 = arith.constant 0 : index
    %5 = vector.load %arg3[%c0_3, %c0_4, %c0_5] : memref<1x16x256xbf16, #tpu.memory_space<vmem>>, vector<1x16x256xbf16>
    %6 = vector.shape_cast %5 : vector<1x16x256xbf16> to vector<16x256xbf16>
    %7 = tpu.concatenate %4, %6 in 0 : vector<16x256xbf16>, vector<16x256xbf16> -> vector<32x256xbf16>
    %c0_6 = arith.constant 0 : index
    %c0_7 = arith.constant 0 : index
    %8 = vector.load %arg4[%c0_6, %c0_7] : memref<256x256xbf16, #tpu.memory_space<vmem>>, vector<256x256xbf16>
    %cst = arith.constant dense<0.000000e+00> : vector<32x256xf32>
    %9 = tpu.matmul %7, %8, %cst {dimension_numbers = #tpu.dot_dimension_numbers<[1], [0], [0], [1], [0, 0, 1, 1], [], []>} : vector<32x256xbf16>, vector<256x256xbf16>, vector<32x256xf32> -> vector<32x256xf32>
    %10 = vector.extract_strided_slice %9 {offsets = [0, 0], sizes = [32, 128], strides = [1, 1]} : vector<32x256xf32> to vector<32x128xf32>
    %11 = vector.extract_strided_slice %9 {offsets = [0, 128], sizes = [32, 128], strides = [1, 1]} : vector<32x256xf32> to vector<32x128xf32>
    %12 = arith.mulf %10, %10 : vector<32x128xf32>
    %13 = arith.mulf %11, %11 : vector<32x128xf32>
    %14 = arith.addf %12, %13 : vector<32x128xf32>
    %cst_8 = arith.constant 1.000000e-07 : f32
    %15 = vector.broadcast %cst_8 : f32 to vector<32x128xf32>
    %16 = arith.maximumf %14, %15 : vector<32x128xf32>
    %17 = vector.extract_strided_slice %16 {offsets = [0, 0], sizes = [16, 128], strides = [1, 1]} : vector<32x128xf32> to vector<16x128xf32>
    %18 = vector.extract_strided_slice %16 {offsets = [16, 0], sizes = [16, 128], strides = [1, 1]} : vector<32x128xf32> to vector<16x128xf32>
    %19 = math.sqrt %18 : vector<16x128xf32>
    %20 = math.sqrt %17 : vector<16x128xf32>
    %21 = arith.subf %19, %20 : vector<16x128xf32>
    %c0_9 = arith.constant 0 : index
    %c0_10 = arith.constant 0 : index
    %c0_11 = arith.constant 0 : index
    %22 = vector.load %arg5[%c0_9, %c0_10, %c0_11] : memref<1x3x128xf32, #tpu.memory_space<vmem>>, vector<1x1x128xf32>
    %23 = vector.shape_cast %22 : vector<1x1x128xf32> to vector<1x128xf32>
    %24 = arith.mulf %21, %21 : vector<16x128xf32>
    %cst_12 = arith.constant dense<0.000000e+00> : vector<128xf32>
    %25 = vector.multi_reduction <add>, %24, %cst_12 [0] : vector<16x128xf32> to vector<128xf32>
    %26 = vector.shape_cast %25 : vector<128xf32> to vector<1x128xf32>
    %27 = arith.addf %23, %26 : vector<1x128xf32>
    %c0_13 = arith.constant 0 : index
    %c0_14 = arith.constant 0 : index
    %c0_15 = arith.constant 0 : index
    %28 = vector.load %arg5[%c0_13, %c0_14, %c0_15] : memref<1x3x128xf32, #tpu.memory_space<vmem>>, vector<1x1x128xf32>
    %29 = vector.shape_cast %28 : vector<1x1x128xf32> to vector<1x128xf32>
    %30 = vector.shape_cast %27 : vector<1x128xf32> to vector<1x1x128xf32>
    tpu.vector_store %arg5[%c0_13, %c0_14, %c0_15], %30 {strides = array<i32>} : memref<1x3x128xf32, #tpu.memory_space<vmem>>, vector<1x1x128xf32>,
    %c0_16 = arith.constant 0 : index
    %c1 = arith.constant 1 : index
    %c0_17 = arith.constant 0 : index
    %31 = vector.load %arg5[%c0_16, %c1, %c0_17] : memref<1x3x128xf32, #tpu.memory_space<vmem>>, vector<1x1x128xf32>
    %32 = vector.shape_cast %31 : vector<1x1x128xf32> to vector<1x128xf32>
    %cst_18 = arith.constant dense<0.000000e+00> : vector<128xf32>
    %33 = vector.multi_reduction <add>, %18, %cst_18 [0] : vector<16x128xf32> to vector<128xf32>
    %34 = vector.shape_cast %33 : vector<128xf32> to vector<1x128xf32>
    %35 = arith.addf %32, %34 : vector<1x128xf32>
    %c0_19 = arith.constant 0 : index
    %c1_20 = arith.constant 1 : index
    %c0_21 = arith.constant 0 : index
    %36 = vector.load %arg5[%c0_19, %c1_20, %c0_21] : memref<1x3x128xf32, #tpu.memory_space<vmem>>, vector<1x1x128xf32>
    %37 = vector.shape_cast %36 : vector<1x1x128xf32> to vector<1x128xf32>
    %38 = vector.shape_cast %35 : vector<1x128xf32> to vector<1x1x128xf32>
    tpu.vector_store %arg5[%c0_19, %c1_20, %c0_21], %38 {strides = array<i32>} : memref<1x3x128xf32, #tpu.memory_space<vmem>>, vector<1x1x128xf32>,
    %c0_22 = arith.constant 0 : index
    %c2 = arith.constant 2 : index
    %c0_23 = arith.constant 0 : index
    %39 = vector.load %arg5[%c0_22, %c2, %c0_23] : memref<1x3x128xf32, #tpu.memory_space<vmem>>, vector<1x1x128xf32>
    %40 = vector.shape_cast %39 : vector<1x1x128xf32> to vector<1x128xf32>
    %41 = arith.divf %17, %18 : vector<16x128xf32>
    %42 = math.log %41 : vector<16x128xf32>
    %43 = math.absf %42 : vector<16x128xf32>
    %cst_24 = arith.constant dense<0.000000e+00> : vector<128xf32>
    %44 = vector.multi_reduction <add>, %43, %cst_24 [0] : vector<16x128xf32> to vector<128xf32>
    %45 = vector.shape_cast %44 : vector<128xf32> to vector<1x128xf32>
    %cst_25 = arith.constant 5.000000e-01 : f32
    %46 = vector.broadcast %cst_25 : f32 to vector<1x128xf32>
    %47 = arith.mulf %46, %45 : vector<1x128xf32>
    %48 = arith.addf %40, %47 : vector<1x128xf32>
    %c0_26 = arith.constant 0 : index
    %c2_27 = arith.constant 2 : index
    %c0_28 = arith.constant 0 : index
    %49 = vector.load %arg5[%c0_26, %c2_27, %c0_28] : memref<1x3x128xf32, #tpu.memory_space<vmem>>, vector<1x1x128xf32>
    %50 = vector.shape_cast %49 : vector<1x1x128xf32> to vector<1x128xf32>
    %51 = vector.shape_cast %48 : vector<1x128xf32> to vector<1x1x128xf32>
    tpu.vector_store %arg5[%c0_26, %c2_27, %c0_28], %51 {strides = array<i32>} : memref<1x3x128xf32, #tpu.memory_space<vmem>>, vector<1x1x128xf32>,
    return
  }
  func.func @transform_0(%arg0: i32, %arg1: i32) -> (i32, i32, i32) {
    %c0_i32 = arith.constant 0 : i32
    %c0_i32_0 = arith.constant 0 : i32
    return %arg0, %arg1, %c0_i32 : i32, i32, i32
  }
  func.func @transform_1(%arg0: i32, %arg1: i32) -> (i32, i32, i32) {
    %c0_i32 = arith.constant 0 : i32
    %c0_i32_0 = arith.constant 0 : i32
    return %arg0, %arg1, %c0_i32 : i32, i32, i32
  }
  func.func @transform_2(%arg0: i32, %arg1: i32) -> (i32, i32) {
    %c0_i32 = arith.constant 0 : i32
    %c0_i32_0 = arith.constant 0 : i32
    %c0_i32_1 = arith.constant 0 : i32
    return %c0_i32, %c0_i32_0 : i32, i32
  }
  func.func @transform_3(%arg0: i32, %arg1: i32) -> (i32, i32, i32) {
    %c0_i32 = arith.constant 0 : i32
    %c0_i32_0 = arith.constant 0 : i32
    %c0_i32_1 = arith.constant 0 : i32
    return %arg0, %c0_i32, %c0_i32_0 : i32, i32, i32
  }
}

</mosaic_0001>

<bundles_post_ra>
// kernel: stft_loss.1
= control target key start
LH: loop header
LB: loop body
LE: loop exit
PB: predicated region body
PF: predicated region fallthrough
CT: control target
= control target key end

     0   :  { %s1042_s12 = smov 0   ;;  %s1044_s13 = smov 0   ;;  %s1345_s0 = inlined_call_operand.vmem [shape: bf16[2,16,256], index: 0, kind: input, shape index: {}]   ;;  %s1346_s1 = inlined_call_operand.vmem [shape: bf16[2,16,256], index: 1, kind: input, shape index: {}]   ;;  %s1347_s2 = inlined_call_operand.vmem [shape: bf16[256,256], index: 2, kind: input, shape index: {}]   ;;  %s1348_s3 = inlined_call_operand.vmem [shape: f32[2,3,128], index: 3, kind: output, shape index: {}]  }
   0x1   :  { %s1046_s14 = smov 0  }
   0x2 LB: > { %s25_s15 = sadd.s32 1, %s1015_s13  ;;  %p766_p0 = scmp.ge.s32.totalorder %s1019_s14, 1  ;;  %s1019_s14 = sphi %s1046_s14, %s13_s14   ;;  %s1015_s13 = sphi %s1044_s13, %s1350_s13   ;;  %s1011_s12 = sphi %s1042_s12, %s1349_s12  }
   0x3   : > { %p27_p1 = scmp.ge.s32.totalorder %s25_s15, 2  ;;  %p175_p2 = scmp.lt.s32.totalorder %s1019_s14, 3 }
   0x5   : > { %s1352_s15 = smov (%p27_p1, %s25_s15), 0  ;;  %p176_p3 = pnand %p766_p0, %p175_p2 }
   0x6   : > { %p214_p4 = scmp.lt.s32.totalorder (!%p176_p3), %s1011_s12, 1 }
   0x7   : > { %179 = sbr.rel (%p176_p3) target bundleno = 262 (0x106), region = 32 }
   0xc   : > { %v846_v0 = vld [vmem:[%s1347_s2 + $0x70] sm:$0xf]  ;;  %v939_v1 = vld [vmem:[%s1347_s2 + $0x74] sm:$0xf0]  ;;  %v938_v5 = vld [vmem:[%s1347_s2 + $0x74] sm:$0xf] }
   0xd   : > { %v910_v2 = vld [vmem:[%s1347_s2 + $0xf0] sm:$0xf]  ;;  %v847_v3 = vor.u32 %v939_v1, %v846_v0  ;;  %v955_v4 = vld [vmem:[%s1347_s2 + $0xf4] sm:$0xf0]  ;;  %v848_v6 = vld [vmem:[%s1347_s2 + $0x78] sm:$0xf0] }
   0xe   : > { %v911_v7 = vor.u32 %v955_v4, %v910_v2  ;;  %v851_v8 = vor.u32 %v938_v5, %v848_v6  ;;  %v954_v9 = vld [vmem:[%s1347_s2 + $0xf4] sm:$0xf]  ;;  %v912_v10 = vld [vmem:[%s1347_s2 + $0xf8] sm:$0xf0]  ;;  %v838_v11 = vld [vmem:[%s1347_s2 + $0x60] sm:$0xf] }
   0xf   : > { %460 = vmatpush.bf16.msra.mxu0 %v847_v3  ;;  %v915_v12 = vor.u32 %v954_v9, %v912_v10  ;;  %v937_v13 = vld [vmem:[%s1347_s2 + $0x64] sm:$0xf0]  ;;  %v902_v14 = vld [vmem:[%s1347_s2 + $0xe0] sm:$0xf]  ;;  %v936_v18 = vld [vmem:[%s1347_s2 + $0x64] sm:$0xf] }
  0x10   : > { %v953_v15 = vld [vmem:[%s1347_s2 + $0xe4] sm:$0xf0]  ;;  %479 = vmatpush.bf16.msra.mxu1 %v911_v7  ;;  %498 = vmatpush.bf16.msra.mxu2 %v851_v8  ;;  %v839_v16 = vor.u32 %v937_v13, %v838_v11  ;;  %v840_v19 = vld [vmem:[%s1347_s2 + $0x68] sm:$0xf0]  ;;  %v952_v20 = vld [vmem:[%s1347_s2 + $0xe4] sm:$0xf] }
  0x11   : > { %v903_v17 = vor.u32 %v953_v15, %v902_v14  ;;  %517 = vmatpush.bf16.msra.mxu3 %v915_v12  ;;  %v843_v21 = vor.u32 %v936_v18, %v840_v19  ;;  %v904_v22 = vld [vmem:[%s1347_s2 + $0xe8] sm:$0xf0]  ;;  %v830_v23 = vld [vmem:[%s1347_s2 + $0x50] sm:$0xf]  ;;  %v935_v24 = vld [vmem:[%s1347_s2 + $0x54] sm:$0xf0] }
  0x12   : > { %v907_v25 = vor.u32 %v952_v20, %v904_v22  ;;  %v894_v26 = vld [vmem:[%s1347_s2 + $0xd0] sm:$0xf]  ;;  %v951_v27 = vld [vmem:[%s1347_s2 + $0xd4] sm:$0xf0]  ;;  %v934_v28 = vld [vmem:[%s1347_s2 + $0x54] sm:$0xf]  ;;  %v831_v29 = vor.u32 %v935_v24, %v830_v23 }
  0x13   : > { %461 = vmatpush.bf16.msra.mxu0 %v839_v16  ;;  %v832_v30 = vld [vmem:[%s1347_s2 + $0x58] sm:$0xf0]  ;;  %v950_v31 = vld [vmem:[%s1347_s2 + $0xd4] sm:$0xf]  ;;  %v895_v33 = vor.u32 %v951_v27, %v894_v26  ;;  %v822_v35 = vld [vmem:[%s1347_s2 + $0x40] sm:$0xf] }
  0x14   : > { %v896_v32 = vld [vmem:[%s1347_s2 + $0xd8] sm:$0xf0]  ;;  %480 = vmatpush.bf16.msra.mxu1 %v903_v17  ;;  %499 = vmatpush.bf16.msra.mxu2 %v843_v21  ;;  %v835_v34 = vor.u32 %v934_v28, %v832_v30  ;;  %v933_v36 = vld [vmem:[%s1347_s2 + $0x44] sm:$0xf0]  ;;  %v886_v37 = vld [vmem:[%s1347_s2 + $0xc0] sm:$0xf] }
  0x15   : > { %518 = vmatpush.bf16.msra.mxu3 %v907_v25  ;;  %v899_v38 = vor.u32 %v950_v31, %v896_v32  ;;  %v949_v39 = vld [vmem:[%s1347_s2 + $0xc4] sm:$0xf0]  ;;  %v932_v40 = vld [vmem:[%s1347_s2 + $0x44] sm:$0xf]  ;;  %v824_v41 = vld [vmem:[%s1347_s2 + $0x48] sm:$0xf0]  ;;  %v823_v44 = vor.u32 %v933_v36, %v822_v35 }
  0x16   : > { %v948_v42 = vld [vmem:[%s1347_s2 + $0xc4] sm:$0xf]  ;;  %v888_v43 = vld [vmem:[%s1347_s2 + $0xc8] sm:$0xf0]  ;;  %v887_v45 = vor.u32 %v949_v39, %v886_v37  ;;  %v827_v46 = vor.u32 %v932_v40, %v824_v41  ;;  %v814_v47 = vld [vmem:[%s1347_s2 + $0x30] sm:$0xf] }
  0x17   : > { %462 = vmatpush.bf16.msra.mxu0 %v831_v29  ;;  %v931_v48 = vld [vmem:[%s1347_s2 + $0x34] sm:$0xf0]  ;;  %v878_v49 = vld [vmem:[%s1347_s2 + $0xb0] sm:$0xf]  ;;  %v891_v50 = vor.u32 %v948_v42, %v888_v43  ;;  %v930_v52 = vld [vmem:[%s1347_s2 + $0x34] sm:$0xf] }
  0x18   : > { %481 = vmatpush.bf16.msra.mxu1 %v895_v33  ;;  %500 = vmatpush.bf16.msra.mxu2 %v835_v34  ;;  %v947_v51 = vld [vmem:[%s1347_s2 + $0xb4] sm:$0xf0]  ;;  %v816_v53 = vld [vmem:[%s1347_s2 + $0x38] sm:$0xf0]  ;;  %v946_v54 = vld [vmem:[%s1347_s2 + $0xb4] sm:$0xf]  ;;  %v815_v56 = vor.u32 %v931_v48, %v814_v47 }
  0x19   : > { %519 = vmatpush.bf16.msra.mxu3 %v899_v38  ;;  %v880_v55 = vld [vmem:[%s1347_s2 + $0xb8] sm:$0xf0]  ;;  %v879_v57 = vor.u32 %v947_v51, %v878_v49  ;;  %v819_v58 = vor.u32 %v930_v52, %v816_v53  ;;  %v806_v59 = vld [vmem:[%s1347_s2 + $0x20] sm:$0xf]  ;;  %v929_v60 = vld [vmem:[%s1347_s2 + $0x24] sm:$0xf0] }
  0x1a   : > { %v870_v61 = vld [vmem:[%s1347_s2 + $0xa0] sm:$0xf]  ;;  %v883_v62 = vor.u32 %v946_v54, %v880_v55  ;;  %v945_v63 = vld [vmem:[%s1347_s2 + $0xa4] sm:$0xf0]  ;;  %v928_v0 = vld [vmem:[%s1347_s2 + $0x24] sm:$0xf]  ;;  %v807_v4 = vor.u32 %v929_v60, %v806_v59 }
  0x1b   : > { %463 = vmatpush.bf16.msra.mxu0 %v823_v44  ;;  %v808_v1 = vld [vmem:[%s1347_s2 + $0x28] sm:$0xf0]  ;;  %v944_v2 = vld [vmem:[%s1347_s2 + $0xa4] sm:$0xf]  ;;  %v798_v5 = vld [vmem:[%s1347_s2 + $0x10] sm:$0xf]  ;;  %v871_v6 = vor.u32 %v945_v63, %v870_v61 }
  0x1c   : > { %482 = vmatpush.bf16.msra.mxu1 %v887_v45  ;;  %501 = vmatpush.bf16.msra.mxu2 %v827_v46  ;;  %v872_v3 = vld [vmem:[%s1347_s2 + $0xa8] sm:$0xf0]  ;;  %v811_v7 = vor.u32 %v928_v0, %v808_v1  ;;  %v927_v8 = vld [vmem:[%s1347_s2 + $0x14] sm:$0xf0]  ;;  %v862_v9 = vld [vmem:[%s1347_s2 + $0x90] sm:$0xf] }
  0x1d   : > { %520 = vmatpush.bf16.msra.mxu3 %v891_v50  ;;  %v943_v10 = vld [vmem:[%s1347_s2 + $0x94] sm:$0xf0]  ;;  %v875_v11 = vor.u32 %v944_v2, %v872_v3  ;;  %v926_v12 = vld [vmem:[%s1347_s2 + $0x14] sm:$0xf]  ;;  %v800_v13 = vld [vmem:[%s1347_s2 + $0x18] sm:$0xf0]  ;;  %v799_v16 = vor.u32 %v927_v8, %v798_v5 }
  0x1e   : > { %v942_v14 = vld [vmem:[%s1347_s2 + $0x94] sm:$0xf]  ;;  %v864_v15 = vld [vmem:[%s1347_s2 + $0x98] sm:$0xf0]  ;;  %v790_v17 = vld [vmem:[%s1347_s2] sm:$0xf]  ;;  %v863_v19 = vor.u32 %v943_v10, %v862_v9  ;;  %v803_v20 = vor.u32 %v926_v12, %v800_v13 }
  0x1f   : > { %464 = vmatpush.bf16.msra.mxu0 %v815_v56  ;;  %v925_v18 = vld [vmem:[%s1347_s2 + $0x4] sm:$0xf0]  ;;  %s1354_s12 = smov (!%p214_p4, %s1011_s12), 1  ;;  %v854_v21 = vld [vmem:[%s1347_s2 + $0x80] sm:$0xf]  ;;  %v867_v23 = vor.u32 %v942_v14, %v864_v15  ;;  %v1021_v29 = vmov 0.0  }
  0x20   : > { %483 = vmatpush.bf16.msra.mxu1 %v879_v57  ;;  %502 = vmatpush.bf16.msra.mxu2 %v819_v58  ;;  %v941_v22 = vld [vmem:[%s1347_s2 + $0x84] sm:$0xf0]  ;;  %v924_v24 = vld [vmem:[%s1347_s2 + $0x4] sm:$0xf]  ;;  %v792_v25 = vld [vmem:[%s1347_s2 + $0x8] sm:$0xf0]  ;;  %v791_v28 = vor.u32 %v925_v18, %v790_v17 }
  0x21   : > { %521 = vmatpush.bf16.msra.mxu3 %v883_v62  ;;  %s918_s25 = sshll.u32 %s1354_s12, 4  ;;  %s771_s26 = sshll.u32 %s1354_s12, 2  ;;  %v940_v26 = vld [vmem:[%s1347_s2 + $0x84] sm:$0xf]  ;;  %v856_v27 = vld [vmem:[%s1347_s2 + $0x88] sm:$0xf0]  ;;  %v855_v32 = vor.u32 %v941_v22, %v854_v21  ;;  %v795_v33 = vor.u32 %v924_v24, %v792_v25 }
  0x22   : > { %s222_s6 = scalar_lea.vmem %s1345_s0, %s918_s25  ;;  %s1268_s9 = scalar_lea.vmem %s1348_s3, %s771_s26  ;;  %v859_v36 = vor.u32 %v940_v26, %v856_v27 }
  0x23   : > { %465 = vmatpush.bf16.msra.mxu0 %v807_v4  ;;  %243 = vst [vmem:[%s1268_s9] sm:$0x7] %v1021_v29  ;;  %v774_v30 = vld [vmem:[%s222_s6] sm:$0xf]  ;;  %v921_v31 = vld [vmem:[%s222_s6 + $0x4] sm:$0xf0]  ;;  %s233_s16 = scalar_lea.vmem %s1346_s1, %s918_s25 }
  0x24   : > { %484 = vmatpush.bf16.msra.mxu1 %v871_v6  ;;  %503 = vmatpush.bf16.msra.mxu2 %v811_v7  ;;  %v920_v34 = vld [vmem:[%s222_s6 + $0x4] sm:$0xf]  ;;  %v776_v35 = vld [vmem:[%s222_s6 + $0x8] sm:$0xf0]  ;;  %v775_v37 = vor.u32 %v921_v31, %v774_v30  ;;  %v782_v39 = vld [vmem:[%s233_s16] sm:$0xf] }
  0x25   : > { %522 = vmatpush.bf16.msra.mxu3 %v875_v11  ;;  %v779_v38 = vor.u32 %v920_v34, %v776_v35  ;;  %v923_v40 = vld [vmem:[%s233_s16 + $0x4] sm:$0xf0]  ;;  %v922_v41 = vld [vmem:[%s233_s16 + $0x4] sm:$0xf]  ;;  %v784_v42 = vld [vmem:[%s233_s16 + $0x8] sm:$0xf0] }
  0x26   : > { %v783_v43 = vor.u32 %v923_v40, %v782_v39  ;;  %v787_v44 = vor.u32 %v922_v41, %v784_v42 }
  0x27   : > { %466 = vmatpush.bf16.msra.mxu0 %v799_v16 }
  0x28   : > { %485 = vmatpush.bf16.msra.mxu1 %v863_v19  ;;  %504 = vmatpush.bf16.msra.mxu2 %v803_v20 }
  0x29   : > { %523 = vmatpush.bf16.msra.mxu3 %v867_v23 }
  0x2b   : > { %467 = vmatpush.bf16.msra.mxu0 %v791_v28 }
  0x2c   : > { %486 = vmatpush.bf16.msra.mxu1 %v855_v32  ;;  %505 = vmatpush.bf16.msra.mxu2 %v795_v33 }
  0x2d   : > { %524 = vmatpush.bf16.msra.mxu3 %v859_v36 }
  0x2e   : > { %468 = vmatmul.bf16.vlgmr.msra.gmra.mxu0 %v775_v37 }
  0x2f   : > { %487 = vmatmul.bf16.vlgmr.msra.gmra.mxu1 %v779_v38  ;;  %506 = vmatmul.bf16.vlgmr.msra.gmra.mxu2 %v775_v37 }
  0x30   : > { %525 = vmatmul.bf16.vlgmr.msra.gmra.mxu3 %v779_v38 }
  0x3e   : > { %473 = vmatmul.bf16.gmra.mxu0 %v783_v43 }
  0x3f   : > { %492 = vmatmul.bf16.gmra.mxu1 %v787_v44  ;;  %511 = vmatmul.bf16.gmra.mxu2 %v783_v43 }
  0x40   : > { %530 = vmatmul.bf16.gmra.mxu3 %v787_v44 }
  0xab   : > { %v469_v45 = vpop.f32.mrf.mxu0 }
  0xac   : > { %v488_v46 = vpop.f32.mrf.mxu1 }
  0xad   : > { %v489_v48 = vadd.f32 %v488_v46, %v469_v45 }
  0xaf   : > { %v536_v53 = vmul.f32 %v489_v48, %v489_v48 }
  0xb2   : > { %v507_v47 = vpop.f32.mrf.mxu2 }
  0xb3   : > { %v526_v49 = vpop.f32.mrf.mxu3  ;;  %v471_v51 = vpop.f32.mrf.mxu0 }
  0xb4   : > { %v527_v50 = vadd.f32 %v526_v49, %v507_v47  ;;  %v490_v52 = vpop.f32.mrf.mxu1 }
  0xb5   : > { %v491_v57 = vadd.f32 %v490_v52, %v471_v51 }
  0xb6   : > { %v540_v54 = vmul.f32 %v527_v50, %v527_v50 }
  0xb7   : > { %v537_v61 = vmul.f32 %v491_v57, %v491_v57 }
  0xb8   : > { %v544_v56 = vadd.f32 %v540_v54, %v536_v53 }
  0xba   : > { %v509_v55 = vpop.f32.mrf.mxu2  ;;  %v1276_v60 = vmax.f32 %v544_v56, 1e-07 }
  0xbb   : > { %v528_v58 = vpop.f32.mrf.mxu3  ;;  %v474_v63 = vpop.f32.mrf.mxu0 }
  0xbc   : > { %v529_v59 = vadd.f32 %v528_v58, %v509_v55  ;;  %v493_v0 = vpop.f32.mrf.mxu1  ;;  %981 = vrsqrt.f32 %v1276_v60  ;;  %vm583_vm4 = vcmp.eq.f32.partialorder %v1276_v60, inf  ;;  %vm585_vm5 = vcmp.eq.f32.partialorder %v1276_v60, 0.0 }
  0xbd   : > { %v494_v1 = vadd.f32 %v493_v0, %v474_v63 }
  0xbe   : > { %v541_v62 = vmul.f32 %v529_v59, %v529_v59 }
  0xbf   : > { %v538_v6 = vmul.f32 %v494_v1, %v494_v1 }
  0xc0   : > { %v545_v2 = vadd.f32 %v541_v62, %v537_v61 }
  0xc2   : > { %v512_v3 = vpop.f32.mrf.mxu2  ;;  %v1279_v4 = vmax.f32 %v545_v2, 1e-07  ;;  %v982_v10 = vpop.eup %981  ;;  %v614_v2 = vld [vmem:[%s1268_s9 + $0x1] sm:$0x1] }
  0xc3   : > { %v531_v5 = vpop.f32.mrf.mxu3  ;;  %v476_v11 = vpop.f32.mrf.mxu0  ;;  %v577_v17 = vmul.f32 %v982_v10, %v1276_v60 }
  0xc4   : > { %v532_v7 = vadd.f32 %v531_v5, %v512_v3  ;;  %983 = vrsqrt.f32 %v1279_v4  ;;  %v495_v12 = vpop.f32.mrf.mxu1  ;;  %vm595_vm8 = vcmp.eq.f32.partialorder %v1279_v4, inf  ;;  %vm597_vm11 = vcmp.eq.f32.partialorder %v1279_v4, 0.0 }
  0xc5   : > { %v496_v18 = vadd.f32 %v495_v12, %v476_v11  ;;  %v578_v21 = vmul.f32 %v982_v10, %v577_v17  ;;  %v586_v12 = vand.u32 2147483648, %v1276_v60 }
  0xc6   : > { %v542_v8 = vmul.f32 %v532_v7, %v532_v7 }
  0xc7   : > { %v539_v22 = vmul.f32 %v496_v18, %v496_v18  ;;  %v579_v29 = vmul.f32 0.5, %v578_v21 }
  0xc8   : > { %v546_v9 = vadd.f32 %v542_v8, %v538_v6 }
  0xc9   : > { %v580_v37 = vsub.f32 1.5, %v579_v29 }
  0xca   : > { %v1282_v13 = vmax.f32 %v546_v9, 1e-07  ;;  %v984_v14 = vpop.eup %983  ;;  %v514_v15 = vpop.f32.mrf.mxu2 }
  0xcb   : > { %v533_v16 = vpop.f32.mrf.mxu3  ;;  %v589_v19 = vmul.f32 %v984_v14, %v1279_v4  ;;  %v581_v48 = vmul.f32 %v982_v10, %v580_v37 }
  0xcc   : > { %985 = vrsqrt.f32 %v1282_v13  ;;  %v534_v20 = vadd.f32 %v533_v16, %v514_v15  ;;  %v562_v41 = vand.u32 2147483648, %v1282_v13  ;;  %vm630_vm1 = vweird.f32 %v1282_v13 }
  0xcd   : > { %987 = vrcp.f32 %v1282_v13  ;;  %v590_v24 = vmul.f32 %v984_v14, %v589_v19  ;;  %v634_v44 = vand.u32 2147483647, %v1282_v13  ;;  %v582_v61 = vmul.f32 %v581_v48, %v1276_v60 }
  0xce   : > { %v543_v23 = vmul.f32 %v534_v20, %v534_v20  ;;  %v637_v51 = vor.u32 1.1754944e-38, %v562_v41  ;;  %vm559_vm6 = vcmp.eq.f32.partialorder %v1282_v13, inf  ;;  %vm561_vm9 = vcmp.eq.f32.partialorder %v1282_v13, 0.0 }
  0xcf   : > { %v591_v32 = vmul.f32 0.5, %v590_v24  ;;  %vm635_vm3 = vcmp.eq.f32.partialorder %v634_v44, 8.507059e+37  ;;  %v584_v11 = vsel %vm583_vm4, %v1276_v60, %v582_v61  ;;  %v602_v44 = vld [vmem:[%s1268_s9] sm:$0x1] }
  0xd0   : > { %v547_v26 = vadd.f32 %v543_v23, %v539_v22  ;;  %v598_v22 = vand.u32 2147483648, %v1279_v4 }
  0xd1   : > { %v592_v39 = vsub.f32 1.5, %v591_v32 }
  0xd2   : > { %v986_v25 = vpop.eup %985  ;;  %v1290_v31 = vmax.f32 %v547_v26, 1e-07 }
  0xd3   : > { %v988_v27 = vpop.eup %987  ;;  %v553_v28 = vmul.f32 %v986_v25, %v1282_v13  ;;  %v593_v50 = vmul.f32 %v984_v14, %v592_v39 }
  0xd4   : > { %v626_v30 = vmul.f32 %v988_v27, %v1282_v13  ;;  %989 = vrsqrt.f32 %v1290_v31  ;;  %v615_v36 = vadd.f32 %v1290_v31, %v1282_v13  ;;  %vm631_vm0 = vweird.f32 %v988_v27 }
  0xd5   : > { %v554_v33 = vmul.f32 %v986_v25, %v553_v28  ;;  %991 = vrcp.f32 %v1290_v31  ;;  %vm632_vm2 = vmor %vm630_vm1, %vm631_vm0  ;;  %v594_v62 = vmul.f32 %v593_v50, %v1279_v4  ;;  %v574_v6 = vand.u32 2147483648, %v1290_v31 }
  0xd6   : > { %v627_v34 = vsub.f32 1.0, %v626_v30  ;;  %v616_v42 = vrot.slane %v615_v36, 4  ;;  %v649_v7 = vand.u32 2147483647, %v1290_v31  ;;  %vm645_vm10 = vweird.f32 %v1290_v31 }
  0xd7   : > { %v555_v35 = vmul.f32 0.5, %v554_v33  ;;  %v596_v17 = vsel %vm595_vm8, %v1279_v4, %v594_v62  ;;  %v652_v19 = vor.u32 1.1754944e-38, %v574_v6  ;;  %vm571_vm14 = vcmp.eq.f32.partialorder %v1290_v31, inf }
  0xd8   : > { %v628_v38 = vmul.f32 %v988_v27, %v627_v34  ;;  %v617_v46 = vadd.f32 %v616_v42, %v615_v36  ;;  %vm650_vm13 = vcmp.eq.f32.partialorder %v649_v7, 8.507059e+37  ;;  %vm573_vm15 = vcmp.eq.f32.partialorder %v1290_v31, 0.0 }
  0xd9   : > { %v556_v40 = vsub.f32 1.5, %v555_v35 }
  0xda   : > { %v629_v43 = vadd.f32 %v988_v27, %v628_v38  ;;  %v990_v47 = vpop.eup %989  ;;  %v618_v53 = vrot.slane %v617_v46, 2 }
  0xdb   : > { %v557_v45 = vmul.f32 %v986_v25, %v556_v40  ;;  %v565_v52 = vmul.f32 %v990_v47, %v1290_v31  ;;  %v992_v54 = vpop.eup %991 }
  0xdc   : > { %v633_v49 = vsel %vm632_vm2, %v988_v27, %v629_v43  ;;  %v619_v58 = vadd.f32 %v618_v53, %v617_v46  ;;  %v641_v59 = vmul.f32 %v992_v54, %v1290_v31  ;;  %vm646_vm7 = vweird.f32 %v992_v54 }
  0xdd   : > { %v558_v55 = vmul.f32 %v557_v45, %v1282_v13  ;;  %v638_v56 = vsel %vm635_vm3, %v637_v51, %v633_v49  ;;  %v566_v57 = vmul.f32 %v990_v47, %v565_v52  ;;  %vm647_vm12 = vmor %vm645_vm10, %vm646_vm7  ;;  %v599_v27 = vsel %vm597_vm11, %v598_v22, %v596_v17  ;;  %v624_v52 = vld [vmem:[%s1268_s9 + $0x2] sm:$0x1] }
  0xde   : > { %v620_v0 = vrot.slane %v619_v58, 1  ;;  %v642_v1 = vsub.f32 1.0, %v641_v59  ;;  %v639_v5 = vmul.f32 %v638_v56, %v1276_v60 }
  0xdf   : > { %v567_v63 = vmul.f32 0.5, %v566_v57  ;;  %v560_v3 = vsel %vm559_vm6, %v1282_v13, %v558_v55  ;;  %v587_v13 = vsel %vm585_vm5, %v586_v12, %v584_v11 }
  0xe0   : > { %v621_v9 = vadd.f32 %v620_v0, %v619_v58  ;;  %v643_v10 = vmul.f32 %v992_v54, %v642_v1  ;;  %v563_v18 = vsel %vm561_vm9, %v562_v41, %v560_v3  ;;  %993 = vlog2.f32 %v639_v5 }
  0xe1   : > { %v568_v8 = vsub.f32 1.5, %v567_v63  ;;  %v600_v24 = vsub.f32 %v563_v18, %v587_v13 }
  0xe2   : > { %v622_v15 = vadd.f32 %v621_v9, %v614_v2  ;;  %v644_v16 = vadd.f32 %v992_v54, %v643_v10 }
  0xe3   : > { %v569_v14 = vmul.f32 %v990_v47, %v568_v8  ;;  %v603_v30 = vmul.f32 %v600_v24, %v600_v24 }
  0xe4   : > { %623 = vst [vmem:[%s1268_s9 + $0x1] sm:$0x1] %v622_v15  ;;  %v648_v21 = vsel %vm647_vm12, %v992_v54, %v644_v16 }
  0xe5   : > { %v570_v20 = vmul.f32 %v569_v14, %v1290_v31  ;;  %v653_v23 = vsel %vm650_vm13, %v652_v19, %v648_v21 }
  0xe6   : > { %v654_v26 = vmul.f32 %v653_v23, %v1279_v4  ;;  %v994_v60 = vpop.eup %993 }
  0xe7   : > { %v572_v25 = vsel %vm571_vm14, %v1290_v31, %v570_v20  ;;  %v656_v34 = vmul.f32 0.6931472, %v994_v60 }
  0xe8   : > { %v575_v28 = vsel %vm573_vm15, %v574_v6, %v572_v25  ;;  %995 = vlog2.f32 %v654_v26 }
  0xe9   : > { %v601_v29 = vsub.f32 %v575_v28, %v599_v27  ;;  %v659_v31 = vand.u32 2147483647, %v656_v34 }
  0xeb   : > { %v604_v32 = vmul.f32 %v601_v29, %v601_v29 }
  0xed   : > { %v605_v33 = vadd.f32 %v604_v32, %v603_v30 }
  0xee   : > { %v996_v35 = vpop.eup %995 }
  0xef   : > { %v606_v36 = vrot.slane %v605_v33, 4  ;;  %v658_v37 = vmul.f32 0.6931472, %v996_v35 }
  0xf1   : > { %v607_v38 = vadd.f32 %v606_v36, %v605_v33  ;;  %v660_v39 = vand.u32 2147483647, %v658_v37 }
  0xf3   : > { %v608_v40 = vrot.slane %v607_v38, 2  ;;  %v661_v4 = vadd.f32 %v660_v39, %v659_v31 }
  0xf5   : > { %v609_v41 = vadd.f32 %v608_v40, %v607_v38  ;;  %v662_v42 = vrot.slane %v661_v4, 4 }
  0xf7   : > { %v610_v43 = vrot.slane %v609_v41, 1  ;;  %v663_v45 = vadd.f32 %v662_v42, %v661_v4 }
  0xf9   : > { %v611_v46 = vadd.f32 %v610_v43, %v609_v41  ;;  %v664_v47 = vrot.slane %v663_v45, 2 }
  0xfb   : > { %v612_v48 = vadd.f32 %v611_v46, %v602_v44  ;;  %v665_v49 = vadd.f32 %v664_v47, %v663_v45 }
  0xfd   : > { %613 = vst [vmem:[%s1268_s9] sm:$0x1] %v612_v48  ;;  %v666_v50 = vrot.slane %v665_v49, 1 }
  0xff   : > { %v667_v51 = vadd.f32 %v666_v50, %v665_v49 }
 0x101   : > { %v668_v53 = vmul.f32 0.5, %v667_v51 }
 0x103   : > { %v669_v54 = vadd.f32 %v668_v53, %v624_v52 }
 0x105   : > { %670 = vst [vmem:[%s1268_s9 + $0x2] sm:$0x1] %v669_v54 }
 0x106 PF: > { %s13_s14 = sadd.s32 1, %s1019_s14   ;;  %s1349_s12 = smov %s1015_s13 }
 0x107   : > { %p10_p5 = scmp.ge.s32.totalorder %s13_s14, 4   ;;  %s1350_s13 = smov %s1352_s15 }
 0x109   :  { %12 = sbr.rel (!%p10_p5) target bundleno = 2 (0x2), region = 69 }

</bundles_post_ra>
